<compile_context>
chip_gen: v5e
topology: v5e:2x2
jax: 0.10.0
libtpu: 0.0.40
codegen_flags: <defaults>
</compile_context>

<pallas_src>
import functools

import jax
import jax.numpy as jnp
from jax.experimental import pallas as pl
from jax.experimental.pallas import tpu as pltpu


def _round_up(a, b):
    return -(-a // b) * b


# ----------------------------- Pallas kernel -------------------------------

def _fused_conv_squash_kernel(p_ref, w_ref, b_ref, g_ref, o_ref):
    """One M-tile of the im2col conv GEMM with bias + squash fused.

    p_ref: (tm, Kp)  bf16 im2col patch tile     (full K resident: no K grid axis)
    w_ref: (Kp, Cp)  bf16 flattened conv weights (resident across all M tiles)
    b_ref: (1,  Cp)  f32  bias (zero on padded lanes)
    g_ref: (Cp, Cp)  bf16 block-diagonal capsule-group selector
    o_ref: (tm, Cp)  bf16 squashed conv output tile
    """
    # Full-K contraction in a single MXU pass per tile, f32 accumulation.
    y = jnp.dot(p_ref[...], w_ref[...],
                preferred_element_type=jnp.float32) + b_ref[...]

    # Per-capsule squared length broadcast back to every lane of the capsule's
    # dim-group via a block-diagonal selector matmul: stays lane-dense, runs on
    # the MXU with bf16 operands (avoids multi-pass f32 MXU emulation), and is
    # exactly zero on padded lanes.
    l2 = jnp.dot((y * y).astype(jnp.bfloat16), g_ref[...],
                 preferred_element_type=jnp.float32)

    # squash: x * l2/(1+l2)/sqrt(l2) == x * sqrt(l2)/(1+l2)  (no 0/0 path).
    # Scale math kept in f32 (v5e VPU/EUP have no bf16 path).
    scale = jnp.sqrt(l2) * pl.reciprocal(1.0 + l2, approx=True)
    o_ref[...] = (y * scale).astype(o_ref.dtype)


# ------------------------------ JAX wrappers --------------------------------

def _im2col_bf16(x, k, stride):
    """x: (N, C, H, W) NCHW -> bf16 (N*Ho*Wo, C*k*k), columns ordered (C, kh, kw)."""
    # TODO(synk): for non-toy sizes this still materializes a k^2-inflated patch
    # matrix in HBM; the clean fix is k*k shifted, accumulated GEMMs that read x
    # tiles directly inside the Pallas grid (strided pl.ds / manual DMA).
    N, C, H, W = x.shape
    Ho = (H - k) // stride + 1
    Wo = (W - k) // stride + 1
    xb = x.astype(jnp.bfloat16)            # cast once, before the k^2 inflation
    cols = []
    for kh in range(k):
        for kw in range(k):
            cols.append(xb[:, :,
                           kh: kh + stride * (Ho - 1) + 1: stride,
                           kw: kw + stride * (Wo - 1) + 1: stride])
    patches = jnp.stack(cols, axis=2)                       # (N, C, k*k, Ho, Wo)
    patches = patches.transpose(0, 3, 4, 1, 2)              # (N, Ho, Wo, C, k*k)
    return patches.reshape(N * Ho * Wo, C * k * k), Ho, Wo


@functools.partial(jax.jit, static_argnums=(3, 4, 5, 6, 7))
def primary_caps_forward(x, weight, bias, output_caps, output_dim,
                         kernel_size, stride, tm=512):
    """x: (N, C_in, H, W) NCHW.  weight: (C_out, C_in, k, k).  bias: (C_out,).

    Returns (N, output_caps * Ho * Wo, output_dim) f32, matching the PyTorch module.
    """
    N = x.shape[0]
    C_out = output_caps * output_dim

    patches, Ho, Wo = _im2col_bf16(x, kernel_size, stride)   # (M, K) bf16
    M, K = patches.shape

    # --- Tiling --------------------------------------------------------------
    # K is resident in VMEM (no reduction grid axis); C_out padded to full lanes.
    Kp = _round_up(K, 128)
    Cp = _round_up(C_out, 128)

    tm = max(8, _round_up(tm, 8))
    m8 = _round_up(M, 8)
    if m8 <= tm:
        # Small-M case: split into two tiles (when M allows) so v7x's two
        # TensorCores both get grid work under "parallel" semantics.
        tm_eff = max(8, _round_up(m8 // 2, 8)) if m8 >= 16 else m8
        Mp = _round_up(m8, tm_eff)
    else:
        tm_eff = tm
        Mp = _round_up(M, tm_eff)
    grid_m = Mp // tm_eff

    # --- Padded operands (single pad pass each, bf16 GEMM operands) ----------
    p = jnp.pad(patches, ((0, Mp - M), (0, Kp - K)))
    w = jnp.pad(weight.reshape(C_out, -1).T.astype(jnp.bfloat16),
                ((0, Kp - K), (0, Cp - C_out)))
    b = jnp.pad(bias.astype(jnp.float32)[None, :], ((0, 0), (0, Cp - C_out)))

    # Block-diagonal selector: G[i, j] = 1 iff lanes i, j belong to the same
    # (valid) capsule's output_dim group.
    lane = jnp.arange(Cp)
    valid = lane < C_out
    cap_id = lane // output_dim
    G = ((cap_id[:, None] == cap_id[None, :])
         & valid[:, None] & valid[None, :]).astype(jnp.bfloat16)

    out = pl.pallas_call(
        _fused_conv_squash_kernel,
        out_shape=jax.ShapeDtypeStruct((Mp, Cp), jnp.bfloat16),
        grid_spec=pltpu.PrefetchScalarGridSpec(
            num_scalar_prefetch=0,
            grid=(grid_m,),
            in_specs=[
                pl.BlockSpec((tm_eff, Kp), lambda i: (i, 0)),   # patches tile
                pl.BlockSpec((Kp, Cp), lambda i: (0, 0)),       # weights (resident)
                pl.BlockSpec((1, Cp), lambda i: (0, 0)),        # bias (resident)
                pl.BlockSpec((Cp, Cp), lambda i: (0, 0)),       # selector (resident)
            ],
            out_specs=pl.BlockSpec((tm_eff, Cp), lambda i: (i, 0)),
        ),
        compiler_params=pltpu.CompilerParams(
            dimension_semantics=("parallel",),
            # Footprint at defaults is <1 MiB (patches 2x tm*Kp*2B, weights
            # Kp*Cp*2B, selector Cp^2*2B, out 2x tm*Cp*2B); 32 MiB is safe on
            # v5e/v6e/v7x. Re-derive if tm/Kp/Cp grow substantially.
            vmem_limit_bytes=32 * 1024 * 1024,
        ),
    )(p, w, b, G)

    # PyTorch: view(N, caps, dim, H, W) -> permute(0,1,3,4,2) -> view(N,-1,dim).
    # Squash is already applied (it only depends on the capsule grouping, which
    # is layout-independent); this is a single cheap bf16 layout pass + f32 cast.
    out = out[:M, :C_out].reshape(N, Ho, Wo, output_caps, output_dim)
    out = out.transpose(0, 3, 1, 2, 4).astype(jnp.float32)
    return out.reshape(N, output_caps * Ho * Wo, output_dim)


# --------------------------------- main -------------------------------------

if __name__ == "__main__":
    # Module hyperparameters (small, consistent with PrimaryCapsLayer).
    input_channels = 4
    output_caps = 8
    output_dim = 4
    kernel_size = 3
    stride = 2

    N, H, W = 2, 16, 16
    C_out = output_caps * output_dim

    key = jax.random.PRNGKey(0)
    kx, kw, kb = jax.random.split(key, 3)

    x = jax.random.normal(kx, (N, input_channels, H, W), dtype=jnp.float32)

    # Deterministic synthetic init (PyTorch-Conv2d-style uniform bound).
    fan_in = input_channels * kernel_size * kernel_size
    bound = 1.0 / (fan_in ** 0.5)
    weight = jax.random.uniform(
        kw, (C_out, input_channels, kernel_size, kernel_size),
        minval=-bound, maxval=bound, dtype=jnp.float32)
    bias = jax.random.uniform(kb, (C_out,), minval=-bound, maxval=bound,
                              dtype=jnp.float32)

    out = primary_caps_forward(x, weight, bias, output_caps, output_dim,
                               kernel_size, stride)
    out = jax.block_until_ready(out)

    # Correctness check against a pure-JAX f32 reference. Kernel uses bf16 GEMM
    # operands + bf16 output with f32 accumulation and approx reciprocal, so
    # accuracy is ~1e-3 relative; tolerance is loosened accordingly.
    conv_ref = jax.lax.conv_general_dilated(
        x, weight, window_strides=(stride, stride), padding="VALID",
        dimension_numbers=("NCHW", "OIHW", "NCHW")) + bias.reshape(1, C_out, 1, 1)
    Ho = (H - kernel_size) // stride + 1
    Wo = (W - kernel_size) // stride + 1
    ref = conv_ref.reshape(N, output_caps, output_dim, Ho, Wo)
    ref = ref.transpose(0, 1, 3, 4, 2).reshape(N, -1, output_dim)
    l2 = jnp.sum(ref * ref, axis=2, keepdims=True)
    ref = ref * (l2 / (1.0 + l2) / jnp.sqrt(l2))

    assert out.shape == (N, output_caps * Ho * Wo, output_dim)
    assert not bool(jnp.any(jnp.isnan(out)))
    assert jnp.allclose(out, ref, atol=2e-2, rtol=2e-2)

    print("KERNEL_OK")
</pallas_src>

<mosaic_0001>
module attributes {stable_mosaic.version = 11 : i64} {
  func.func @_fused_conv_squash_kernel(%arg0: i32, %arg1: memref<56x128xbf16, #tpu.memory_space<vmem>>, %arg2: memref<128x128xbf16, #tpu.memory_space<vmem>>, %arg3: memref<1x128xf32, #tpu.memory_space<vmem>>, %arg4: memref<128x128xbf16, #tpu.memory_space<vmem>>, %arg5: memref<56x128xbf16, #tpu.memory_space<vmem>>) attributes {dimension_semantics = [#tpu.dimension_semantics<parallel>], iteration_bounds = array<i64: 2>, scalar_prefetch = 0 : i64, scratch_operands = 0 : i64, tpu.core_type = #tpu.core_type<tc>, window_params = [{transform_indices = @transform_0, window_bounds = array<i64: 56, 128>}, {pipeline_mode = #tpu.pipeline_mode<synchronous>, transform_indices = @transform_1, window_bounds = array<i64: 128, 128>}, {pipeline_mode = #tpu.pipeline_mode<synchronous>, transform_indices = @transform_2, window_bounds = array<i64: 1, 128>}, {pipeline_mode = #tpu.pipeline_mode<synchronous>, transform_indices = @transform_3, window_bounds = array<i64: 128, 128>}, {transform_indices = @transform_4, window_bounds = array<i64: 56, 128>}]} {
    %c0 = arith.constant 0 : index
    %c0_0 = arith.constant 0 : index
    %0 = vector.load %arg1[%c0, %c0_0] : memref<56x128xbf16, #tpu.memory_space<vmem>>, vector<56x128xbf16>
    %c0_1 = arith.constant 0 : index
    %c0_2 = arith.constant 0 : index
    %1 = vector.load %arg2[%c0_1, %c0_2] : memref<128x128xbf16, #tpu.memory_space<vmem>>, vector<128x128xbf16>
    %cst = arith.constant dense<0.000000e+00> : vector<56x128xf32>
    %2 = tpu.matmul %0, %1, %cst {dimension_numbers = #tpu.dot_dimension_numbers<[1], [0], [0], [1], [0, 0, 1, 1], [], []>} : vector<56x128xbf16>, vector<128x128xbf16>, vector<56x128xf32> -> vector<56x128xf32>
    %c0_3 = arith.constant 0 : index
    %c0_4 = arith.constant 0 : index
    %3 = vector.load %arg3[%c0_3, %c0_4] : memref<1x128xf32, #tpu.memory_space<vmem>>, vector<1x128xf32>
    %4 = vector.broadcast %3 : vector<1x128xf32> to vector<56x128xf32>
    %5 = arith.addf %2, %4 : vector<56x128xf32>
    %6 = arith.mulf %5, %5 : vector<56x128xf32>
    %7 = arith.truncf %6 : vector<56x128xf32> to vector<56x128xbf16>
    %c0_5 = arith.constant 0 : index
    %c0_6 = arith.constant 0 : index
    %8 = vector.load %arg4[%c0_5, %c0_6] : memref<128x128xbf16, #tpu.memory_space<vmem>>, vector<128x128xbf16>
    %cst_7 = arith.constant dense<0.000000e+00> : vector<56x128xf32>
    %9 = tpu.matmul %7, %8, %cst_7 {dimension_numbers = #tpu.dot_dimension_numbers<[1], [0], [0], [1], [0, 0, 1, 1], [], []>} : vector<56x128xbf16>, vector<128x128xbf16>, vector<56x128xf32> -> vector<56x128xf32>
    %10 = math.sqrt %9 : vector<56x128xf32>
    %cst_8 = arith.constant 1.000000e+00 : f32
    %11 = vector.broadcast %cst_8 : f32 to vector<56x128xf32>
    %12 = arith.addf %11, %9 : vector<56x128xf32>
    %13 = tpu.reciprocal %12 {approx = true} : vector<56x128xf32> -> vector<56x128xf32>
    %14 = arith.mulf %10, %13 : vector<56x128xf32>
    %15 = arith.mulf %5, %14 : vector<56x128xf32>
    %16 = arith.truncf %15 : vector<56x128xf32> to vector<56x128xbf16>
    %c0_9 = arith.constant 0 : index
    %c0_10 = arith.constant 0 : index
    %17 = vector.load %arg5[%c0_9, %c0_10] : memref<56x128xbf16, #tpu.memory_space<vmem>>, vector<56x128xbf16>
    tpu.vector_store %arg5[%c0_9, %c0_10], %16 {strides = array<i32>} : memref<56x128xbf16, #tpu.memory_space<vmem>>, vector<56x128xbf16>,
    return
  }
  func.func @transform_0(%arg0: i32) -> (i32, i32) {
    %c0_i32 = arith.constant 0 : i32
    %c0_i32_0 = arith.constant 0 : i32
    return %arg0, %c0_i32 : i32, i32
  }
  func.func @transform_1(%arg0: i32) -> (i32, i32) {
    %c0_i32 = arith.constant 0 : i32
    %c0_i32_0 = arith.constant 0 : i32
    %c0_i32_1 = arith.constant 0 : i32
    return %c0_i32, %c0_i32_0 : i32, i32
  }
  func.func @transform_2(%arg0: i32) -> (i32, i32) {
    %c0_i32 = arith.constant 0 : i32
    %c0_i32_0 = arith.constant 0 : i32
    %c0_i32_1 = arith.constant 0 : i32
    return %c0_i32, %c0_i32_0 : i32, i32
  }
  func.func @transform_3(%arg0: i32) -> (i32, i32) {
    %c0_i32 = arith.constant 0 : i32
    %c0_i32_0 = arith.constant 0 : i32
    %c0_i32_1 = arith.constant 0 : i32
    return %c0_i32, %c0_i32_0 : i32, i32
  }
  func.func @transform_4(%arg0: i32) -> (i32, i32) {
    %c0_i32 = arith.constant 0 : i32
    %c0_i32_0 = arith.constant 0 : i32
    return %arg0, %c0_i32 : i32, i32
  }
}

</mosaic_0001>

<bundles_post_ra>
// kernel: primary_caps_forward.1
= control target key start
LH: loop header
LB: loop body
LE: loop exit
PB: predicated region body
PF: predicated region fallthrough
CT: control target
= control target key end

     0   :  { %s818_s15 = smov 0   ;;  %s984_s0 = inlined_call_operand.vmem [shape: bf16[112,128], index: 0, kind: input, shape index: {}]   ;;  %s985_s1 = inlined_call_operand.vmem [shape: bf16[128,128], index: 1, kind: input, shape index: {}]   ;;  %s986_s2 = inlined_call_operand.vmem [shape: f32[1,128], index: 2, kind: input, shape index: {}]   ;;  %s987_s3 = inlined_call_operand.vmem [shape: bf16[128,128], index: 3, kind: input, shape index: {}]   ;;  %s988_s4 = inlined_call_operand.vmem [shape: bf16[112,128], index: 4, kind: output, shape index: {}]  }
   0x1 LB: > { %s611_s16 = sadd.s32 4294967295, %s791_s15   ;;  %p615_p0 = scmp.ge.s32.totalorder %s791_s15, 1  ;;  %s791_s15 = sphi %s818_s15, %s14_s15  }
   0x2   : > { %p163_p1 = scmp.lt.s32.totalorder %s791_s15, 3 }
   0x4   : > { %p164_p2 = pnand %p615_p0, %p163_p1 }
   0x5   : > { %s189_s25 = smul.u32 (!%p164_p2), 7, %s611_s16 }
   0x6   : > { %167 = sbr.rel (%p164_p2) target bundleno = 365 (0x16d), region = 36 }
   0x7   : > { %p190_p3 = scmp.lt.s32.totalorder (!%p164_p2), %s189_s25, 13 }
   0xb   : > { %v706_v0 = vld [vmem:[%s985_s1 + $0x38] sm:$0xff]  ;;  %v705_v1 = vld [vmem:[%s985_s1 + $0x30] sm:$0xff]  ;;  %v704_v2 = vld [vmem:[%s985_s1 + $0x28] sm:$0xff]  ;;  %s990_s25 = smov (!%p190_p3, %s189_s25), 13 }
   0xc   : > { %298 = vmatpush.bf16.msra.mxu0 %v706_v0  ;;  %732 = vmatpush.bf16.msra.mxu2 %v706_v0  ;;  %v703_v3 = vld [vmem:[%s985_s1 + $0x20] sm:$0xff]  ;;  %v702_v4 = vld [vmem:[%s985_s1 + $0x18] sm:$0xff]  ;;  %v701_v6 = vld [vmem:[%s985_s1 + $0x10] sm:$0xff]  ;;  %s616_s10 = sshll.u32 %s990_s25, 2 }
   0xd   : > { %v714_v5 = vld [vmem:[%s987_s3 + $0x38] sm:$0xff]  ;;  %v713_v7 = vld [vmem:[%s987_s3 + $0x30] sm:$0xff]  ;;  %v700_v8 = vld [vmem:[%s985_s1 + $0x8] sm:$0xff]  ;;  %s193_s18 = scalar_lea.vmem %s984_s0, %s616_s10  ;;  %s941_s8 = scalar_lea.vmem %s988_s4, %s616_s10 }
   0xe   : > { %401 = vmatpush.bf16.msra.mxu1 %v714_v5  ;;  %740 = vmatpush.bf16.msra.mxu3 %v714_v5  ;;  %v712_v9 = vld [vmem:[%s987_s3 + $0x28] sm:$0xff]  ;;  %v699_v10 = vld [vmem:[%s985_s1] sm:$0xff]  ;;  %v698_v13 = vld [vmem:[%s193_s18 + $0x10] sm:$0xff] }
   0xf   : > { %v711_v11 = vld [vmem:[%s987_s3 + $0x20] sm:$0xff]  ;;  %v207_v14 = vld [vmem:[%s193_s18 + $0x18] sm:$0xf]  ;;  %v697_v16 = vld [vmem:[%s193_s18 + $0x8] sm:$0xff] }
  0x10   : > { %299 = vmatpush.bf16.msra.mxu0 %v705_v1  ;;  %733 = vmatpush.bf16.msra.mxu2 %v705_v1  ;;  %v696_v12 = vld [vmem:[%s193_s18] sm:$0xff]  ;;  %v241_v15 = vunpack.c.l.b16 %v207_v14  ;;  %v710_v18 = vld [vmem:[%s987_s3 + $0x18] sm:$0xff]  ;;  %v709_v19 = vld [vmem:[%s987_s3 + $0x10] sm:$0xff] }
  0x11   : > { %v708_v20 = vld [vmem:[%s987_s3 + $0x8] sm:$0xff]  ;;  %v707_v21 = vld [vmem:[%s987_s3] sm:$0xff] }
  0x12   : > { %402 = vmatpush.bf16.msra.mxu1 %v713_v7  ;;  %741 = vmatpush.bf16.msra.mxu3 %v713_v7  ;;  %v245_v17 = vpack.c.b16 %v241_v15, %v241_v15  ;;  %v756_v23 = vld [vmem:[%s986_s2] ss:$0 sm:$0xff] }
  0x14   : > { %300 = vmatpush.bf16.msra.mxu0 %v704_v2  ;;  %734 = vmatpush.bf16.msra.mxu2 %v704_v2 }
  0x16   : > { %403 = vmatpush.bf16.msra.mxu1 %v712_v9  ;;  %742 = vmatpush.bf16.msra.mxu3 %v712_v9 }
  0x18   : > { %301 = vmatpush.bf16.msra.mxu0 %v703_v3  ;;  %735 = vmatpush.bf16.msra.mxu2 %v703_v3 }
  0x1a   : > { %404 = vmatpush.bf16.msra.mxu1 %v711_v11  ;;  %743 = vmatpush.bf16.msra.mxu3 %v711_v11 }
  0x1c   : > { %302 = vmatpush.bf16.msra.mxu0 %v702_v4  ;;  %736 = vmatpush.bf16.msra.mxu2 %v702_v4 }
  0x1e   : > { %405 = vmatpush.bf16.msra.mxu1 %v710_v18  ;;  %744 = vmatpush.bf16.msra.mxu3 %v710_v18 }
  0x20   : > { %303 = vmatpush.bf16.msra.mxu0 %v701_v6  ;;  %737 = vmatpush.bf16.msra.mxu2 %v701_v6 }
  0x22   : > { %406 = vmatpush.bf16.msra.mxu1 %v709_v19  ;;  %745 = vmatpush.bf16.msra.mxu3 %v709_v19 }
  0x24   : > { %304 = vmatpush.bf16.msra.mxu0 %v700_v8  ;;  %738 = vmatpush.bf16.msra.mxu2 %v700_v8 }
  0x26   : > { %407 = vmatpush.bf16.msra.mxu1 %v708_v20  ;;  %746 = vmatpush.bf16.msra.mxu3 %v708_v20 }
  0x28   : > { %305 = vmatpush.bf16.msra.mxu0 %v699_v10  ;;  %739 = vmatpush.bf16.msra.mxu2 %v699_v10 }
  0x2a   : > { %408 = vmatpush.bf16.msra.mxu1 %v707_v21  ;;  %747 = vmatpush.bf16.msra.mxu3 %v707_v21 }
  0x2b   : > { %306 = vmatmul.bf16.vlgmr.msra.gmra.mxu0 %v696_v12  ;;  %316 = vmatmul.bf16.vlgmr.msra.gmra.mxu2 %v698_v13 }
  0x3b   : > { %311 = vmatmul.bf16.gmra.mxu0 %v697_v16  ;;  %321 = vmatmul.bf16.gmra.mxu2 %v245_v17 }
  0xa8   : > { %v307_v22 = vpop.f32.mrf.mxu0 }
  0xa9   : > { %v885_v25 = vadd.f32 %v756_v23, %v307_v22 }
  0xab   : > { %v326_v28 = vmul.f32 %v885_v25, %v885_v25 }
  0xae   : > { %v317_v24 = vpop.f32.mrf.mxu2 }
  0xaf   : > { %v893_v30 = vadd.f32 %v756_v23, %v317_v24 }
  0xb0   : > { %v309_v26 = vpop.f32.mrf.mxu0 }
  0xb1   : > { %v887_v27 = vadd.f32 %v756_v23, %v309_v26  ;;  %v330_v35 = vmul.f32 %v893_v30, %v893_v30 }
  0xb3   : > { %v327_v29 = vmul.f32 %v887_v27, %v887_v27 }
  0xb5   : > { %v333_v31 = vpack.c.bf16 %v327_v29, %v326_v28 }
  0xb6   : > { %v319_v32 = vpop.f32.mrf.mxu2 }
  0xb7   : > { %v895_v33 = vadd.f32 %v756_v23, %v319_v32  ;;  %409 = vmatmul.bf16.vlgmr.msra.gmra.mxu1 %v333_v31 }
  0xb8   : > { %v312_v34 = vpop.f32.mrf.mxu0 }
  0xb9   : > { %v331_v36 = vmul.f32 %v895_v33, %v895_v33  ;;  %v901_v39 = vadd.f32 %v756_v23, %v312_v34 }
  0xbb   : > { %v335_v37 = vpack.c.bf16 %v331_v36, %v330_v35  ;;  %v328_v43 = vmul.f32 %v901_v39, %v901_v39 }
  0xbd   : > { %419 = vmatmul.bf16.vlgmr.msra.gmra.mxu3 %v335_v37 }
  0xbe   : > { %v322_v38 = vpop.f32.mrf.mxu2 }
  0xbf   : > { %v903_v41 = vadd.f32 %v756_v23, %v322_v38 }
  0xc0   : > { %v314_v40 = vpop.f32.mrf.mxu0 }
  0xc1   : > { %v905_v42 = vadd.f32 %v756_v23, %v314_v40  ;;  %v332_v46 = vmul.f32 %v903_v41, %v903_v41 }
  0xc3   : > { %v329_v44 = vmul.f32 %v905_v42, %v905_v42  ;;  %v336_v48 = vpack.c.bf16 %v332_v46, %v332_v46 }
  0xc5   : > { %v334_v45 = vpack.c.bf16 %v329_v44, %v328_v43 }
  0xc6   : > { %v324_v47 = vpop.f32.mrf.mxu2 }
  0xc7   : > { %414 = vmatmul.bf16.gmra.mxu1 %v334_v45 }
  0xcd   : > { %424 = vmatmul.bf16.gmra.mxu3 %v336_v48 }
 0x134   : > { %v410_v49 = vpop.f32.mrf.mxu1 }
 0x135   : > { %757 = vrsqrt.f32 %v410_v49  ;;  %v513_v59 = vadd.f32 1.0, %v410_v49  ;;  %vm436_vm0 = vcmp.eq.f32.partialorder %v410_v49, inf  ;;  %v439_v6 = vand.u32 2147483648, %v410_v49 }
 0x136   : > { %vm438_vm1 = vcmp.eq.f32.partialorder %v410_v49, 0.0 }
 0x13b   : > { %v758_v50 = vpop.eup %757 }
 0x13c   : > { %v430_v51 = vmul.f32 %v758_v50, %v410_v49  ;;  %v412_v52 = vpop.f32.mrf.mxu1 }
 0x13d   : > { %759 = vrsqrt.f32 %v412_v52  ;;  %v514_v1 = vadd.f32 1.0, %v412_v52  ;;  %vm448_vm2 = vcmp.eq.f32.partialorder %v412_v52, inf  ;;  %vm450_vm3 = vcmp.eq.f32.partialorder %v412_v52, 0.0 }
 0x13e   : > { %v431_v53 = vmul.f32 %v758_v50, %v430_v51  ;;  %v451_v21 = vand.u32 2147483648, %v412_v52 }
 0x140   : > { %v432_v54 = vmul.f32 0.5, %v431_v53  ;;  %v913_v55 = vpop.f32.mrf.mxu3 }
 0x141   : > { %761 = vrsqrt.f32 %v913_v55  ;;  %v517_v32 = vadd.f32 1.0, %v913_v55  ;;  %vm484_vm4 = vcmp.eq.f32.partialorder %v913_v55, inf  ;;  %vm486_vm5 = vcmp.eq.f32.partialorder %v913_v55, 0.0 }
 0x142   : > { %v433_v56 = vsub.f32 1.5, %v432_v54 }
 0x143   : > { %v760_v57 = vpop.eup %759 }
 0x144   : > { %v434_v58 = vmul.f32 %v758_v50, %v433_v56  ;;  %v442_v60 = vmul.f32 %v760_v57, %v412_v52  ;;  %v916_v61 = vpop.f32.mrf.mxu1  ;;  %v487_v50 = vand.u32 2147483648, %v913_v55 }
 0x145   : > { %763 = vrsqrt.f32 %v916_v61  ;;  %vm460_vm6 = vcmp.eq.f32.partialorder %v916_v61, inf  ;;  %vm462_vm9 = vcmp.eq.f32.partialorder %v916_v61, 0.0 }
 0x146   : > { %v435_v62 = vmul.f32 %v434_v58, %v410_v49  ;;  %v443_v63 = vmul.f32 %v760_v57, %v442_v60  ;;  %765 = vrcp.f32 %v513_v59  ;;  %v463_v59 = vand.u32 2147483648, %v916_v61 }
 0x147   : > { %v762_v0 = vpop.eup %761 }
 0x148   : > { %v444_v2 = vmul.f32 0.5, %v443_v63  ;;  %v478_v3 = vmul.f32 %v762_v0, %v913_v55  ;;  %v920_v4 = vpop.f32.mrf.mxu3  ;;  %v437_v5 = vsel %vm436_vm0, %v410_v49, %v435_v62 }
 0x149   : > { %767 = vrsqrt.f32 %v920_v4  ;;  %v440_v10 = vsel %vm438_vm1, %v439_v6, %v437_v5  ;;  %v518_v38 = vadd.f32 1.0, %v920_v4  ;;  %vm496_vm7 = vcmp.eq.f32.partialorder %v920_v4, inf }
 0x14a   : > { %v445_v7 = vsub.f32 1.5, %v444_v2  ;;  %v479_v8 = vmul.f32 %v762_v0, %v478_v3  ;;  %769 = vrcp.f32 %v514_v1  ;;  %vm498_vm8 = vcmp.eq.f32.partialorder %v920_v4, 0.0 }
 0x14b   : > { %v764_v9 = vpop.eup %763  ;;  %v499_v1 = vand.u32 2147483648, %v920_v4 }
 0x14c   : > { %v446_v11 = vmul.f32 %v760_v57, %v445_v7  ;;  %v480_v12 = vmul.f32 0.5, %v479_v8  ;;  %v454_v13 = vmul.f32 %v764_v9, %v916_v61  ;;  %v924_v14 = vpop.f32.mrf.mxu1  ;;  %v766_v15 = vpop.eup %765 }
 0x14d   : > { %771 = vrsqrt.f32 %v924_v14  ;;  %v527_v20 = vmul.f32 %v766_v15, %v440_v10  ;;  %v516_v54 = vadd.f32 1.0, %v924_v14  ;;  %vm472_vm10 = vcmp.eq.f32.partialorder %v924_v14, inf }
 0x14e   : > { %v447_v16 = vmul.f32 %v446_v11, %v412_v52  ;;  %v481_v17 = vsub.f32 1.5, %v480_v12  ;;  %v455_v18 = vmul.f32 %v764_v9, %v454_v13  ;;  %vm474_vm11 = vcmp.eq.f32.partialorder %v924_v14, 0.0 }
 0x14f   : > { %v768_v19 = vpop.eup %767  ;;  %v534_v43 = vmul.f32 %v527_v20, %v885_v25  ;;  %v515_v25 = vadd.f32 1.0, %v916_v61 }
 0x150   : > { %v449_v22 = vsel %vm448_vm2, %v412_v52, %v447_v16  ;;  %v482_v23 = vmul.f32 %v762_v0, %v481_v17  ;;  %v456_v24 = vmul.f32 0.5, %v455_v18  ;;  %v490_v26 = vmul.f32 %v768_v19, %v920_v4  ;;  %v928_v28 = vpop.f32.mrf.mxu3  ;;  %v770_v29 = vpop.eup %769 }
 0x151   : > { %v452_v31 = vsel %vm450_vm3, %v451_v21, %v449_v22  ;;  %773 = vrsqrt.f32 %v928_v28  ;;  %v519_v10 = vadd.f32 1.0, %v928_v28  ;;  %v475_v18 = vand.u32 2147483648, %v924_v14 }
 0x152   : > { %v528_v34 = vmul.f32 %v770_v29, %v452_v31  ;;  %v483_v35 = vmul.f32 %v482_v23, %v913_v55  ;;  %v457_v36 = vsub.f32 1.5, %v456_v24  ;;  %v491_v37 = vmul.f32 %v768_v19, %v490_v26 }
 0x153   : > { %v772_v40 = vpop.eup %771  ;;  %775 = vrcp.f32 %v517_v32  ;;  %vm508_vm12 = vcmp.eq.f32.partialorder %v928_v28, inf  ;;  %v511_v31 = vand.u32 2147483648, %v928_v28  ;;  %vm510_vm13 = vcmp.eq.f32.partialorder %v928_v28, 0.0 }
 0x154   : > { %v535_v44 = vmul.f32 %v528_v34, %v887_v27  ;;  %v458_v45 = vmul.f32 %v764_v9, %v457_v36  ;;  %v492_v46 = vmul.f32 0.5, %v491_v37  ;;  %v466_v47 = vmul.f32 %v772_v40, %v924_v14 }
 0x155   : > { %v485_v49 = vsel %vm484_vm4, %v913_v55, %v483_v35  ;;  %777 = vrcp.f32 %v518_v38 }
 0x156   : > { %v718_v48 = vpack.c.bf16 %v535_v44, %v534_v43  ;;  %v493_v27 = vsub.f32 1.5, %v492_v46  ;;  %v459_v51 = vmul.f32 %v458_v45, %v916_v61  ;;  %v467_v52 = vmul.f32 %v772_v40, %v466_v47 }
 0x157   : > { %v774_v57 = vpop.eup %773  ;;  %v488_v58 = vsel %vm486_vm5, %v487_v50, %v485_v49  ;;  %779 = vrcp.f32 %v515_v25 }
 0x158   : > { %719 = vst [vmem:[%s941_s8] sm:$0xff] %v718_v48   ;;  %v494_v53 = vmul.f32 %v768_v19, %v493_v27  ;;  %v427_v56 = vpop.f32.mrf.mxu3  ;;  %v468_v60 = vmul.f32 0.5, %v467_v52  ;;  %v502_v63 = vmul.f32 %v774_v57, %v928_v28  ;;  %v461_v55 = vsel %vm460_vm6, %v916_v61, %v459_v51 }
 0x159   : > { %v776_v0 = vpop.eup %775  ;;  %781 = vrcp.f32 %v516_v54  ;;  %v464_v11 = vsel %vm462_vm9, %v463_v59, %v461_v55 }
 0x15a   : > { %v495_v62 = vmul.f32 %v494_v53, %v920_v4  ;;  %v469_v2 = vsub.f32 1.5, %v468_v60  ;;  %v531_v3 = vmul.f32 %v776_v0, %v488_v58  ;;  %v503_v6 = vmul.f32 %v774_v57, %v502_v63 }
 0x15b   : > { %v778_v7 = vpop.eup %777  ;;  %783 = vrcp.f32 %v519_v10 }
 0x15c   : > { %v497_v5 = vsel %vm496_vm7, %v920_v4, %v495_v62  ;;  %v470_v9 = vmul.f32 %v772_v40, %v469_v2  ;;  %v504_v13 = vmul.f32 0.5, %v503_v6  ;;  %v538_v4 = vmul.f32 %v531_v3, %v893_v30 }
 0x15d   : > { %v500_v8 = vsel %vm498_vm8, %v499_v1, %v497_v5  ;;  %v780_v16 = vpop.eup %779 }
 0x15e   : > { %v532_v12 = vmul.f32 %v778_v7, %v500_v8  ;;  %v471_v15 = vmul.f32 %v470_v9, %v924_v14  ;;  %v505_v61 = vsub.f32 1.5, %v504_v13  ;;  %v529_v19 = vmul.f32 %v780_v16, %v464_v11 }
 0x15f   : > { %v782_v21 = vpop.eup %781 }
 0x160   : > { %v539_v17 = vmul.f32 %v532_v12, %v895_v33  ;;  %v473_v20 = vsel %vm472_vm10, %v924_v14, %v471_v15  ;;  %v506_v24 = vmul.f32 %v774_v57, %v505_v61  ;;  %v536_v33 = vmul.f32 %v529_v19, %v901_v39 }
 0x161   : > { %v476_v23 = vsel %vm474_vm11, %v475_v18, %v473_v20  ;;  %v784_v32 = vpop.eup %783 }
 0x162   : > { %v728_v22 = vpack.c.bf16 %v539_v17, %v538_v4  ;;  %v530_v26 = vmul.f32 %v782_v21, %v476_v23  ;;  %v507_v30 = vmul.f32 %v506_v24, %v928_v28 }
 0x164   : > { %731 = vst [vmem:[%s941_s8 + $0x10] sm:$0xff] %v728_v22   ;;  %v537_v29 = vmul.f32 %v530_v26, %v905_v42  ;;  %v509_v14 = vsel %vm508_vm12, %v928_v28, %v507_v30 }
 0x165   : > { %v512_v35 = vsel %vm510_vm13, %v511_v31, %v509_v14 }
 0x166   : > { %v723_v34 = vpack.c.bf16 %v537_v29, %v536_v33  ;;  %v533_v36 = vmul.f32 %v784_v32, %v512_v35 }
 0x168   : > { %730 = vst [vmem:[%s941_s8 + $0x8] sm:$0xff] %v723_v34   ;;  %v540_v37 = vmul.f32 %v533_v36, %v903_v41 }
 0x16a   : > { %v547_v38 = vpack.c.bf16 %v540_v37, %v540_v37 }
 0x16c   : > { %554 = vst [vmem:[%s941_s8 + $0x18] sm:$0xf] %v547_v38 }
 0x16d PF: > { %s14_s15 = sadd.s32 1, %s791_s15  }
 0x16e   : > { %p11_p4 = scmp.ge.s32.totalorder %s14_s15, 4  }
 0x170   :  { %13 = sbr.rel (!%p11_p4) target bundleno = 1 (0x1), region = 66 }

</bundles_post_ra>
